<compile_context>
chip_gen: v7x
topology: tpu7x:2x2x1
jax: 0.10.0
libtpu: 0.0.40
codegen_flags: <defaults>
</compile_context>

<pallas_src>
import functools

import jax
import jax.numpy as jnp
from jax.experimental import pallas as pl
from jax.experimental.pallas import tpu as pltpu

BN_EPS = 1e-5


def _round_up(x, m):
    return (x + m - 1) // m * m


def _vmem_capacity_bytes():
    try:
        return int(pltpu.get_tpu_info().vmem_capacity_bytes)
    except Exception:
        return 64 << 20  # conservative: v7x per-TensorCore VMEM


# ---------------------------------------------------------------------------
# Kernels
# ---------------------------------------------------------------------------

def _fused_single_pass_kernel(heads_ref, tails_ref, rels_ref,
                              wt_ref, wf_ref, bf_ref, alpha_ref,
                              out_ref, *, total_batch, hp):
    """Whole-batch fast path: stats + normalize + fused MLP in one body."""
    cdt = wt_ref.dtype
    heads = heads_ref[...]
    tails = tails_ref[...]
    rels = rels_ref[...]

    # transGraph (bias dropped: BN(train) cancels per-column constant shifts).
    th = jnp.dot(heads.astype(cdt), wt_ref[...], preferred_element_type=jnp.float32)
    tt = jnp.dot(tails.astype(cdt), wt_ref[...], preferred_element_type=jnp.float32)

    inv_n = 1.0 / float(total_batch)

    def bn_chunk(v):                       # per-chunk batch statistics (f32)
        m = jnp.sum(v, axis=0, keepdims=True) * inv_n
        q = jnp.sum(v * v, axis=0, keepdims=True) * inv_n
        var = jnp.maximum(q - m * m, 0.0)  # biased variance (train-mode BN)
        return m, jax.lax.rsqrt(var + BN_EPS)

    mh, ih = bn_chunk(th)
    mt, it = bn_chunk(tt)
    mr, ir = bn_chunk(rels)

    def mm_chunk(v, m, istd, c):           # (x_c - mean_c)*inv_std_c @ Wf[c]
        xn = ((v - m) * istd).astype(cdt)
        return jnp.dot(xn, wf_ref[c * hp:(c + 1) * hp, :],
                       preferred_element_type=jnp.float32)

    y = mm_chunk(th, mh, ih, 0) + mm_chunk(tt, mt, it, 1) + mm_chunk(rels, mr, ir, 2)
    y = y + bf_ref[...]
    y = jnp.where(y >= 0.0, y, alpha_ref[...] * y)      # PReLU, per-MLP slope

    # Lane-aligned slab writes (hp % 128 == 0): [res | head | tail].
    out_ref[:, 0 * hp:1 * hp] = rels + y[:, 0 * hp:1 * hp]
    out_ref[:, 1 * hp:2 * hp] = heads + y[:, 1 * hp:2 * hp]
    out_ref[:, 2 * hp:3 * hp] = tails + y[:, 2 * hp:3 * hp]


def _stats_kernel(heads_ref, tails_ref, rels_ref, wt_ref, stats_ref, *, hp):
    """Per-tile partial sums / sums-of-squares of x = [th | tt | rels]."""
    cdt = wt_ref.dtype
    th = jnp.dot(heads_ref[...].astype(cdt), wt_ref[...],
                 preferred_element_type=jnp.float32)
    tt = jnp.dot(tails_ref[...].astype(cdt), wt_ref[...],
                 preferred_element_type=jnp.float32)
    rels = rels_ref[...]

    rows = [
        jnp.sum(th, axis=0, keepdims=True),
        jnp.sum(tt, axis=0, keepdims=True),
        jnp.sum(rels, axis=0, keepdims=True),
        jnp.sum(th * th, axis=0, keepdims=True),
        jnp.sum(tt * tt, axis=0, keepdims=True),
        jnp.sum(rels * rels, axis=0, keepdims=True),
        jnp.zeros((2, hp), jnp.float32),
    ]
    stats_ref[0] = jnp.concatenate(rows, axis=0)         # [8, hp] lane-dense


def _apply_kernel(heads_ref, tails_ref, rels_ref,
                  wt_ref, wf_ref, scale_ref, bias_ref, alpha_ref,
                  out_ref, *, hp):
    """Streaming apply: y = (x * inv_std) @ Wf + bias' (mean folded into bias')."""
    cdt = wt_ref.dtype
    heads = heads_ref[...]
    tails = tails_ref[...]
    rels = rels_ref[...]

    th = jnp.dot(heads.astype(cdt), wt_ref[...], preferred_element_type=jnp.float32)
    tt = jnp.dot(tails.astype(cdt), wt_ref[...], preferred_element_type=jnp.float32)

    def mm_chunk(v, c):
        xn = (v * scale_ref[:, c * hp:(c + 1) * hp]).astype(cdt)
        return jnp.dot(xn, wf_ref[c * hp:(c + 1) * hp, :],
                       preferred_element_type=jnp.float32)

    y = mm_chunk(th, 0) + mm_chunk(tt, 1) + mm_chunk(rels, 2) + bias_ref[...]
    y = jnp.where(y >= 0.0, y, alpha_ref[...] * y)

    out_ref[:, 0 * hp:1 * hp] = rels + y[:, 0 * hp:1 * hp]
    out_ref[:, 1 * hp:2 * hp] = heads + y[:, 1 * hp:2 * hp]
    out_ref[:, 2 * hp:3 * hp] = tails + y[:, 2 * hp:3 * hp]


# ---------------------------------------------------------------------------
# Parameter folding / padding + wrapper
# ---------------------------------------------------------------------------

def _fold_params(params, hp, compute_dtype):
    """Fold BN affine into the MLP weights, stack the 3 MLPs, pad H -> hp."""
    H = params["wt"].shape[0]
    g = params["gamma"]                       # [3, 3H]   (order: res, head, tail)
    b = params["beta"]                        # [3, 3H]
    W = params["wmlp"]                        # [3, 3H, H]  (used as x @ W_i)
    bm = params["bmlp"]                       # [3, H]

    Wg = g[:, :, None] * W                                # diag(gamma_i) @ W_i
    bg = jnp.einsum("ik,ikh->ih", b, W) + bm              # beta_i @ W_i + b_i

    # Fused weight, padded per chunk:
    #   rows = x columns  [th(hp) | tt(hp) | rels(hp)]
    #   cols = outputs    [res(hp) | head(hp) | tail(hp)]
    Wg4 = Wg.reshape(3, 3, H, H)                          # [mlp, chunk, H_in, H_out]
    Wpad = jnp.zeros((3, 3, hp, hp), jnp.float32).at[:, :, :H, :H].set(Wg4)
    wf = Wpad.transpose(1, 2, 0, 3).reshape(3 * hp, 3 * hp)

    bf = jnp.zeros((3, hp), jnp.float32).at[:, :H].set(bg).reshape(1, 3 * hp)
    wt = jnp.zeros((hp, hp), jnp.float32).at[:H, :H].set(params["wt"])
    alpha = jnp.repeat(params["alpha"], hp)[None, :]      # [1, 3hp]

    # transGraph bias (params["bt"]) is intentionally dropped: BN cancels it.
    return dict(wt=wt.astype(compute_dtype),
                wf=wf.astype(compute_dtype),
                wf_f32=wf, bf=bf, alpha=alpha)


def feat_integration(heads, tails, rels_ori, params, *,
                     compute_dtype=jnp.bfloat16, tb=None, force_stream=False):
    B, H = heads.shape
    hp = _round_up(H, 128)
    hp3 = 3 * hp
    fp = _fold_params(params, hp, compute_dtype)

    itemsize = jnp.dtype(compute_dtype).itemsize
    weight_bytes = 2 * 10 * hp * hp * itemsize + 32 * hp * 4  # incl. double-buffers

    cap = _vmem_capacity_bytes()
    budget = int(0.75 * cap)                                  # headroom for compiler

    def pad_acts(bp):
        def pad(a):
            return jnp.pad(a, ((0, bp - B), (0, hp - H)))
        return pad(heads), pad(tails), pad(rels_ori)

    bp_fast = _round_up(B, 8)
    # inputs + output + in-body temporaries (th/tt/y/residual), all VMEM-resident
    fast_bytes = 4 * bp_fast * hp * 16 + weight_bytes
    use_fast = (not force_stream) and fast_bytes <= int(0.5 * cap)

    if use_fast:
        h_p, t_p, r_p = pad_acts(bp_fast)
        vmem_limit = int(min(budget, max(int(1.25 * fast_bytes) + (4 << 20), 32 << 20)))
        out = pl.pallas_call(
            functools.partial(_fused_single_pass_kernel, total_batch=B, hp=hp),
            out_shape=jax.ShapeDtypeStruct((bp_fast, hp3), jnp.float32),
            grid_spec=pltpu.PrefetchScalarGridSpec(
                num_scalar_prefetch=0,
                grid=(1,),
                in_specs=[
                    pl.BlockSpec((bp_fast, hp), lambda i: (0, 0)),
                    pl.BlockSpec((bp_fast, hp), lambda i: (0, 0)),
                    pl.BlockSpec((bp_fast, hp), lambda i: (0, 0)),
                    pl.BlockSpec((hp, hp), lambda i: (0, 0)),
                    pl.BlockSpec((hp3, hp3), lambda i: (0, 0)),
                    pl.BlockSpec((1, hp3), lambda i: (0, 0)),
                    pl.BlockSpec((1, hp3), lambda i: (0, 0)),
                ],
                out_specs=pl.BlockSpec((bp_fast, hp3), lambda i: (0, 0)),
            ),
            compiler_params=pltpu.CompilerParams(
                dimension_semantics=("arbitrary",),
                vmem_limit_bytes=vmem_limit),
        )(h_p, t_p, r_p, fp["wt"], fp["wf"], fp["bf"], fp["alpha"])
    else:
        # -------- streaming: stats call + apply call, batch axis "parallel" ----
        if tb is None:
            tb = 8
            for cand in (1024, 512, 256, 128, 64, 32, 16, 8):
                if 4 * cand * hp * 24 + weight_bytes <= int(0.6 * cap):
                    tb = cand
                    break
        assert tb % 8 == 0
        bp = _round_up(B, tb)
        nb = bp // tb
        h_p, t_p, r_p = pad_acts(bp)

        stream_bytes = 4 * tb * hp * 24 + weight_bytes
        vmem_limit = int(min(budget, max(int(1.25 * stream_bytes) + (4 << 20), 32 << 20)))

        act_spec = pl.BlockSpec((tb, hp), lambda i: (i, 0))

        def const_spec(shape):
            return pl.BlockSpec(shape, lambda i: (0, 0))      # resident weights

        # Pass 1: per-tile partials (rows: sum_th, sum_tt, sum_rel, sq_th, sq_tt,
        # sq_rel, 0, 0). No carried scratch -> "parallel" (megacore / dual-TC).
        stats = pl.pallas_call(
            functools.partial(_stats_kernel, hp=hp),
            out_shape=jax.ShapeDtypeStruct((nb, 8, hp), jnp.float32),
            grid_spec=pltpu.PrefetchScalarGridSpec(
                num_scalar_prefetch=0,
                grid=(nb,),
                in_specs=[act_spec, act_spec, act_spec, const_spec((hp, hp))],
                out_specs=pl.BlockSpec((1, 8, hp), lambda i: (i, 0, 0)),
            ),
            compiler_params=pltpu.CompilerParams(
                dimension_semantics=("parallel",),
                vmem_limit_bytes=vmem_limit),
        )(h_p, t_p, r_p, fp["wt"])

        # Tiny XLA glue: reduce partials, fold -mean*inv_std into the bias.
        s = jnp.sum(stats, axis=0)                                   # [8, hp]
        sums = jnp.concatenate([s[0], s[1], s[2]])[None, :]          # [1, 3hp]
        sqs = jnp.concatenate([s[3], s[4], s[5]])[None, :]
        mean = sums / B                                              # real batch size
        var = jnp.maximum(sqs / B - mean * mean, 0.0)
        inv_std = jax.lax.rsqrt(var + BN_EPS)
        bias_adj = fp["bf"] - (mean * inv_std) @ fp["wf_f32"]        # [1, 3hp]

        out = pl.pallas_call(
            functools.partial(_apply_kernel, hp=hp),
            out_shape=jax.ShapeDtypeStruct((bp, hp3), jnp.float32),
            grid_spec=pltpu.PrefetchScalarGridSpec(
                num_scalar_prefetch=0,
                grid=(nb,),
                in_specs=[
                    act_spec, act_spec, act_spec,
                    const_spec((hp, hp)), const_spec((hp3, hp3)),
                    const_spec((1, hp3)), const_spec((1, hp3)), const_spec((1, hp3)),
                ],
                out_specs=pl.BlockSpec((tb, hp3), lambda i: (i, 0)),
            ),
            compiler_params=pltpu.CompilerParams(
                dimension_semantics=("parallel",),
                vmem_limit_bytes=vmem_limit),
        )(h_p, t_p, r_p, fp["wt"], fp["wf"], inv_std, bias_adj, fp["alpha"])

    rels_new = out[:B, 0:H]
    heads_new = out[:B, hp:hp + H]
    tails_new = out[:B, 2 * hp:2 * hp + H]
    return heads_new, tails_new, rels_new


# ---------------------------------------------------------------------------
# Synthetic parameters + pure-JAX reference (mirrors the PyTorch forward)
# ---------------------------------------------------------------------------

def init_params(key, hid_feats, rel_total):
    H = hid_feats
    ks = jax.random.split(key, 8)

    def xavier(k, fan_in, fan_out, shape):
        bound = (6.0 / (fan_in + fan_out)) ** 0.5
        return jax.random.uniform(k, shape, jnp.float32, -bound, bound)

    rel_emb = xavier(ks[0], rel_total, H, (rel_total, H))          # nn.Embedding
    wt = xavier(ks[1], H, H, (H, H))                               # transGraph ([in,out])
    bt = jax.random.uniform(ks[2], (1, H), jnp.float32, -H ** -0.5, H ** -0.5)
    wk = jax.random.split(ks[3], 3)
    wmlp = jnp.stack([xavier(k, 3 * H, H, (3 * H, H)) for k in wk])  # [3,3H,H] res/head/tail
    bmlp = jax.random.uniform(ks[4], (3, H), jnp.float32,
                              -(3 * H) ** -0.5, (3 * H) ** -0.5)
    # Randomized (instead of the fresh-module 1/0/0.25 init) so the BN-affine
    # fold and per-MLP PReLU slopes are genuinely exercised by the check.
    gamma = jax.random.uniform(ks[5], (3, 3 * H), jnp.float32, 0.5, 1.5)
    beta = 0.1 * jax.random.normal(ks[6], (3, 3 * H), jnp.float32)
    alpha = jax.random.uniform(ks[7], (3,), jnp.float32, 0.1, 0.4)
    return dict(rel_emb=rel_emb, wt=wt, bt=bt, wmlp=wmlp, bmlp=bmlp,
                gamma=gamma, beta=beta, alpha=alpha)


def reference(heads, tails, rels_idx, p):
    """Pure-JAX f32 reference (train-mode BN, transGraph bias included)."""
    rels_ori = jnp.take(p["rel_emb"], rels_idx, axis=0)
    th = heads @ p["wt"] + p["bt"]
    tt = tails @ p["wt"] + p["bt"]
    x = jnp.concatenate([th, tt, rels_ori], axis=-1)
    mean = x.mean(0, keepdims=True)
    var = ((x - mean) ** 2).mean(0, keepdims=True)
    xh = (x - mean) / jnp.sqrt(var + BN_EPS)

    def mlp(i):
        xn = xh * p["gamma"][i] + p["beta"][i]
        y = xn @ p["wmlp"][i] + p["bmlp"][i]
        return jnp.where(y >= 0, y, p["alpha"][i] * y)

    return heads + mlp(1), tails + mlp(2), rels_ori + mlp(0)


if __name__ == "__main__":
    REL_TOTAL = 10
    H = 32
    key = jax.random.PRNGKey(0)
    k_p, k1, k2 = jax.random.split(key, 3)
    params = init_params(k_p, H, REL_TOTAL)

    def make_inputs(k, B):
        kh, kt, kr = jax.random.split(k, 3)
        return (jax.random.normal(kh, (B, H), jnp.float32),
                jax.random.normal(kt, (B, H), jnp.float32),
                jax.random.randint(kr, (B,), 0, REL_TOTAL, jnp.int32))

    def check(got, ref, atol, rtol):
        for g, r in zip(got, ref):
            err = float(jnp.max(jnp.abs(g - r)))
            assert jnp.allclose(g, r, atol=atol, rtol=rtol), err

    # --- fast path (whole batch resident in VMEM) --------------------------
    heads, tails, rels = make_inputs(k1, 8)
    # Embedding gather is data-dependent glue; done in plain JAX.
    rels_ori = jnp.take(params["rel_emb"], rels, axis=0)
    ref = reference(heads, tails, rels, params)

    out = feat_integration(heads, tails, rels_ori, params, compute_dtype=jnp.float32)
    jax.block_until_ready(out)
    check(out, ref, 1e-4, 1e-4)

    out = feat_integration(heads, tails, rels_ori, params, compute_dtype=jnp.bfloat16)
    jax.block_until_ready(out)
    check(out, ref, 5e-2, 5e-2)

    # --- streaming path (stats + apply calls), batch not divisible by tile --
    heads, tails, rels = make_inputs(k2, 60)
    rels_ori = jnp.take(params["rel_emb"], rels, axis=0)
    ref = reference(heads, tails, rels, params)

    out = feat_integration(heads, tails, rels_ori, params,
                           compute_dtype=jnp.float32, tb=16, force_stream=True)
    jax.block_until_ready(out)
    check(out, ref, 1e-4, 1e-4)

    out = feat_integration(heads, tails, rels_ori, params,
                           compute_dtype=jnp.bfloat16, tb=16, force_stream=True)
    jax.block_until_ready(out)
    check(out, ref, 5e-2, 5e-2)

    print("KERNEL_OK")
</pallas_src>

<mosaic_0001>
module attributes {stable_mosaic.version = 11 : i64} {
  func.func @_fused_single_pass_kernel(%arg0: i32, %arg1: memref<8x128xf32, #tpu.memory_space<vmem>>, %arg2: memref<8x128xf32, #tpu.memory_space<vmem>>, %arg3: memref<8x128xf32, #tpu.memory_space<vmem>>, %arg4: memref<128x128xf32, #tpu.memory_space<vmem>>, %arg5: memref<384x384xf32, #tpu.memory_space<vmem>>, %arg6: memref<1x384xf32, #tpu.memory_space<vmem>>, %arg7: memref<1x384xf32, #tpu.memory_space<vmem>>, %arg8: memref<8x384xf32, #tpu.memory_space<vmem>>) attributes {dimension_semantics = [#tpu.dimension_semantics<arbitrary>], iteration_bounds = array<i64: 1>, scalar_prefetch = 0 : i64, scratch_operands = 0 : i64, tpu.core_type = #tpu.core_type<tc>, window_params = [{pipeline_mode = #tpu.pipeline_mode<synchronous>, transform_indices = @transform_0, window_bounds = array<i64: 8, 128>}, {pipeline_mode = #tpu.pipeline_mode<synchronous>, transform_indices = @transform_1, window_bounds = array<i64: 8, 128>}, {pipeline_mode = #tpu.pipeline_mode<synchronous>, transform_indices = @transform_2, window_bounds = array<i64: 8, 128>}, {pipeline_mode = #tpu.pipeline_mode<synchronous>, transform_indices = @transform_3, window_bounds = array<i64: 128, 128>}, {pipeline_mode = #tpu.pipeline_mode<synchronous>, transform_indices = @transform_4, window_bounds = array<i64: 384, 384>}, {pipeline_mode = #tpu.pipeline_mode<synchronous>, transform_indices = @transform_5, window_bounds = array<i64: 1, 384>}, {pipeline_mode = #tpu.pipeline_mode<synchronous>, transform_indices = @transform_6, window_bounds = array<i64: 1, 384>}, {pipeline_mode = #tpu.pipeline_mode<synchronous>, transform_indices = @transform_7, window_bounds = array<i64: 8, 384>}]} {
    %c0 = arith.constant 0 : index
    %c0_0 = arith.constant 0 : index
    %0 = vector.load %arg1[%c0, %c0_0] : memref<8x128xf32, #tpu.memory_space<vmem>>, vector<8x128xf32>
    %c0_1 = arith.constant 0 : index
    %c0_2 = arith.constant 0 : index
    %1 = vector.load %arg2[%c0_1, %c0_2] : memref<8x128xf32, #tpu.memory_space<vmem>>, vector<8x128xf32>
    %c0_3 = arith.constant 0 : index
    %c0_4 = arith.constant 0 : index
    %2 = vector.load %arg3[%c0_3, %c0_4] : memref<8x128xf32, #tpu.memory_space<vmem>>, vector<8x128xf32>
    %c0_5 = arith.constant 0 : index
    %c0_6 = arith.constant 0 : index
    %3 = vector.load %arg4[%c0_5, %c0_6] : memref<128x128xf32, #tpu.memory_space<vmem>>, vector<128x128xf32>
    %cst = arith.constant dense<0.000000e+00> : vector<8x128xf32>
    %4 = tpu.matmul %0, %3, %cst {dimension_numbers = #tpu.dot_dimension_numbers<[1], [0], [0], [1], [0, 0, 1, 1], [], []>} : vector<8x128xf32>, vector<128x128xf32>, vector<8x128xf32> -> vector<8x128xf32>
    %c0_7 = arith.constant 0 : index
    %c0_8 = arith.constant 0 : index
    %5 = vector.load %arg4[%c0_7, %c0_8] : memref<128x128xf32, #tpu.memory_space<vmem>>, vector<128x128xf32>
    %cst_9 = arith.constant dense<0.000000e+00> : vector<8x128xf32>
    %6 = tpu.matmul %1, %5, %cst_9 {dimension_numbers = #tpu.dot_dimension_numbers<[1], [0], [0], [1], [0, 0, 1, 1], [], []>} : vector<8x128xf32>, vector<128x128xf32>, vector<8x128xf32> -> vector<8x128xf32>
    %cst_10 = arith.constant dense<0.000000e+00> : vector<128xf32>
    %7 = vector.multi_reduction <add>, %4, %cst_10 [0] : vector<8x128xf32> to vector<128xf32>
    %8 = vector.shape_cast %7 : vector<128xf32> to vector<1x128xf32>
    %cst_11 = arith.constant 1.250000e-01 : f32
    %9 = vector.broadcast %cst_11 : f32 to vector<1x128xf32>
    %10 = arith.mulf %8, %9 : vector<1x128xf32>
    %11 = arith.mulf %4, %4 : vector<8x128xf32>
    %cst_12 = arith.constant dense<0.000000e+00> : vector<128xf32>
    %12 = vector.multi_reduction <add>, %11, %cst_12 [0] : vector<8x128xf32> to vector<128xf32>
    %13 = vector.shape_cast %12 : vector<128xf32> to vector<1x128xf32>
    %cst_13 = arith.constant 1.250000e-01 : f32
    %14 = vector.broadcast %cst_13 : f32 to vector<1x128xf32>
    %15 = arith.mulf %13, %14 : vector<1x128xf32>
    %16 = arith.mulf %10, %10 : vector<1x128xf32>
    %17 = arith.subf %15, %16 : vector<1x128xf32>
    %cst_14 = arith.constant 0.000000e+00 : f32
    %18 = vector.broadcast %cst_14 : f32 to vector<1x128xf32>
    %19 = arith.maximumf %17, %18 : vector<1x128xf32>
    %cst_15 = arith.constant 9.99999974E-6 : f32
    %20 = vector.broadcast %cst_15 : f32 to vector<1x128xf32>
    %21 = arith.addf %19, %20 : vector<1x128xf32>
    %22 = math.rsqrt %21 : vector<1x128xf32>
    %cst_16 = arith.constant dense<0.000000e+00> : vector<128xf32>
    %23 = vector.multi_reduction <add>, %6, %cst_16 [0] : vector<8x128xf32> to vector<128xf32>
    %24 = vector.shape_cast %23 : vector<128xf32> to vector<1x128xf32>
    %cst_17 = arith.constant 1.250000e-01 : f32
    %25 = vector.broadcast %cst_17 : f32 to vector<1x128xf32>
    %26 = arith.mulf %24, %25 : vector<1x128xf32>
    %27 = arith.mulf %6, %6 : vector<8x128xf32>
    %cst_18 = arith.constant dense<0.000000e+00> : vector<128xf32>
    %28 = vector.multi_reduction <add>, %27, %cst_18 [0] : vector<8x128xf32> to vector<128xf32>
    %29 = vector.shape_cast %28 : vector<128xf32> to vector<1x128xf32>
    %cst_19 = arith.constant 1.250000e-01 : f32
    %30 = vector.broadcast %cst_19 : f32 to vector<1x128xf32>
    %31 = arith.mulf %29, %30 : vector<1x128xf32>
    %32 = arith.mulf %26, %26 : vector<1x128xf32>
    %33 = arith.subf %31, %32 : vector<1x128xf32>
    %cst_20 = arith.constant 0.000000e+00 : f32
    %34 = vector.broadcast %cst_20 : f32 to vector<1x128xf32>
    %35 = arith.maximumf %33, %34 : vector<1x128xf32>
    %cst_21 = arith.constant 9.99999974E-6 : f32
    %36 = vector.broadcast %cst_21 : f32 to vector<1x128xf32>
    %37 = arith.addf %35, %36 : vector<1x128xf32>
    %38 = math.rsqrt %37 : vector<1x128xf32>
    %cst_22 = arith.constant dense<0.000000e+00> : vector<128xf32>
    %39 = vector.multi_reduction <add>, %2, %cst_22 [0] : vector<8x128xf32> to vector<128xf32>
    %40 = vector.shape_cast %39 : vector<128xf32> to vector<1x128xf32>
    %cst_23 = arith.constant 1.250000e-01 : f32
    %41 = vector.broadcast %cst_23 : f32 to vector<1x128xf32>
    %42 = arith.mulf %40, %41 : vector<1x128xf32>
    %43 = arith.mulf %2, %2 : vector<8x128xf32>
    %cst_24 = arith.constant dense<0.000000e+00> : vector<128xf32>
    %44 = vector.multi_reduction <add>, %43, %cst_24 [0] : vector<8x128xf32> to vector<128xf32>
    %45 = vector.shape_cast %44 : vector<128xf32> to vector<1x128xf32>
    %cst_25 = arith.constant 1.250000e-01 : f32
    %46 = vector.broadcast %cst_25 : f32 to vector<1x128xf32>
    %47 = arith.mulf %45, %46 : vector<1x128xf32>
    %48 = arith.mulf %42, %42 : vector<1x128xf32>
    %49 = arith.subf %47, %48 : vector<1x128xf32>
    %cst_26 = arith.constant 0.000000e+00 : f32
    %50 = vector.broadcast %cst_26 : f32 to vector<1x128xf32>
    %51 = arith.maximumf %49, %50 : vector<1x128xf32>
    %cst_27 = arith.constant 9.99999974E-6 : f32
    %52 = vector.broadcast %cst_27 : f32 to vector<1x128xf32>
    %53 = arith.addf %51, %52 : vector<1x128xf32>
    %54 = math.rsqrt %53 : vector<1x128xf32>
    %55 = vector.broadcast %10 : vector<1x128xf32> to vector<8x128xf32>
    %56 = arith.subf %4, %55 : vector<8x128xf32>
    %57 = vector.broadcast %22 : vector<1x128xf32> to vector<8x128xf32>
    %58 = arith.mulf %56, %57 : vector<8x128xf32>
    %c0_28 = arith.constant 0 : index
    %c0_29 = arith.constant 0 : index
    %59 = vector.load %arg5[%c0_28, %c0_29] : memref<384x384xf32, #tpu.memory_space<vmem>>, vector<128x384xf32>
    %cst_30 = arith.constant dense<0.000000e+00> : vector<8x384xf32>
    %60 = tpu.matmul %58, %59, %cst_30 {dimension_numbers = #tpu.dot_dimension_numbers<[1], [0], [0], [1], [0, 0, 1, 1], [], []>} : vector<8x128xf32>, vector<128x384xf32>, vector<8x384xf32> -> vector<8x384xf32>
    %61 = vector.broadcast %26 : vector<1x128xf32> to vector<8x128xf32>
    %62 = arith.subf %6, %61 : vector<8x128xf32>
    %63 = vector.broadcast %38 : vector<1x128xf32> to vector<8x128xf32>
    %64 = arith.mulf %62, %63 : vector<8x128xf32>
    %c128 = arith.constant 128 : index
    %c0_31 = arith.constant 0 : index
    %65 = vector.load %arg5[%c128, %c0_31] : memref<384x384xf32, #tpu.memory_space<vmem>>, vector<128x384xf32>
    %cst_32 = arith.constant dense<0.000000e+00> : vector<8x384xf32>
    %66 = tpu.matmul %64, %65, %cst_32 {dimension_numbers = #tpu.dot_dimension_numbers<[1], [0], [0], [1], [0, 0, 1, 1], [], []>} : vector<8x128xf32>, vector<128x384xf32>, vector<8x384xf32> -> vector<8x384xf32>
    %67 = arith.addf %60, %66 : vector<8x384xf32>
    %68 = vector.broadcast %42 : vector<1x128xf32> to vector<8x128xf32>
    %69 = arith.subf %2, %68 : vector<8x128xf32>
    %70 = vector.broadcast %54 : vector<1x128xf32> to vector<8x128xf32>
    %71 = arith.mulf %69, %70 : vector<8x128xf32>
    %c256 = arith.constant 256 : index
    %c0_33 = arith.constant 0 : index
    %72 = vector.load %arg5[%c256, %c0_33] : memref<384x384xf32, #tpu.memory_space<vmem>>, vector<128x384xf32>
    %cst_34 = arith.constant dense<0.000000e+00> : vector<8x384xf32>
    %73 = tpu.matmul %71, %72, %cst_34 {dimension_numbers = #tpu.dot_dimension_numbers<[1], [0], [0], [1], [0, 0, 1, 1], [], []>} : vector<8x128xf32>, vector<128x384xf32>, vector<8x384xf32> -> vector<8x384xf32>
    %74 = arith.addf %67, %73 : vector<8x384xf32>
    %c0_35 = arith.constant 0 : index
    %c0_36 = arith.constant 0 : index
    %75 = vector.load %arg6[%c0_35, %c0_36] : memref<1x384xf32, #tpu.memory_space<vmem>>, vector<1x384xf32>
    %76 = vector.broadcast %75 : vector<1x384xf32> to vector<8x384xf32>
    %77 = arith.addf %74, %76 : vector<8x384xf32>
    %cst_37 = arith.constant 0.000000e+00 : f32
    %78 = vector.broadcast %cst_37 : f32 to vector<8x384xf32>
    %79 = arith.cmpf oge, %77, %78 : vector<8x384xf32>
    %c0_38 = arith.constant 0 : index
    %c0_39 = arith.constant 0 : index
    %80 = vector.load %arg7[%c0_38, %c0_39] : memref<1x384xf32, #tpu.memory_space<vmem>>, vector<1x384xf32>
    %81 = vector.broadcast %80 : vector<1x384xf32> to vector<8x384xf32>
    %82 = arith.mulf %81, %77 : vector<8x384xf32>
    %83 = arith.select %79, %77, %82 : vector<8x384xi1>, vector<8x384xf32>
    %84 = vector.extract_strided_slice %83 {offsets = [0, 0], sizes = [8, 128], strides = [1, 1]} : vector<8x384xf32> to vector<8x128xf32>
    %85 = arith.addf %2, %84 : vector<8x128xf32>
    %c0_40 = arith.constant 0 : index
    %c0_41 = arith.constant 0 : index
    %86 = vector.load %arg8[%c0_40, %c0_41] : memref<8x384xf32, #tpu.memory_space<vmem>>, vector<8x128xf32>
    tpu.vector_store %arg8[%c0_40, %c0_41], %85 {strides = array<i32>} : memref<8x384xf32, #tpu.memory_space<vmem>>, vector<8x128xf32>,
    %87 = vector.extract_strided_slice %83 {offsets = [0, 128], sizes = [8, 128], strides = [1, 1]} : vector<8x384xf32> to vector<8x128xf32>
    %88 = arith.addf %0, %87 : vector<8x128xf32>
    %c0_42 = arith.constant 0 : index
    %c128_43 = arith.constant 128 : index
    %89 = vector.load %arg8[%c0_42, %c128_43] : memref<8x384xf32, #tpu.memory_space<vmem>>, vector<8x128xf32>
    tpu.vector_store %arg8[%c0_42, %c128_43], %88 {strides = array<i32>} : memref<8x384xf32, #tpu.memory_space<vmem>>, vector<8x128xf32>,
    %90 = vector.extract_strided_slice %83 {offsets = [0, 256], sizes = [8, 128], strides = [1, 1]} : vector<8x384xf32> to vector<8x128xf32>
    %91 = arith.addf %1, %90 : vector<8x128xf32>
    %c0_44 = arith.constant 0 : index
    %c256_45 = arith.constant 256 : index
    %92 = vector.load %arg8[%c0_44, %c256_45] : memref<8x384xf32, #tpu.memory_space<vmem>>, vector<8x128xf32>
    tpu.vector_store %arg8[%c0_44, %c256_45], %91 {strides = array<i32>} : memref<8x384xf32, #tpu.memory_space<vmem>>, vector<8x128xf32>,
    return
  }
  func.func @transform_0(%arg0: i32) -> (i32, i32) {
    %c0_i32 = arith.constant 0 : i32
    %c0_i32_0 = arith.constant 0 : i32
    %c0_i32_1 = arith.constant 0 : i32
    return %c0_i32, %c0_i32_0 : i32, i32
  }
  func.func @transform_1(%arg0: i32) -> (i32, i32) {
    %c0_i32 = arith.constant 0 : i32
    %c0_i32_0 = arith.constant 0 : i32
    %c0_i32_1 = arith.constant 0 : i32
    return %c0_i32, %c0_i32_0 : i32, i32
  }
  func.func @transform_2(%arg0: i32) -> (i32, i32) {
    %c0_i32 = arith.constant 0 : i32
    %c0_i32_0 = arith.constant 0 : i32
    %c0_i32_1 = arith.constant 0 : i32
    return %c0_i32, %c0_i32_0 : i32, i32
  }
  func.func @transform_3(%arg0: i32) -> (i32, i32) {
    %c0_i32 = arith.constant 0 : i32
    %c0_i32_0 = arith.constant 0 : i32
    %c0_i32_1 = arith.constant 0 : i32
    return %c0_i32, %c0_i32_0 : i32, i32
  }
  func.func @transform_4(%arg0: i32) -> (i32, i32) {
    %c0_i32 = arith.constant 0 : i32
    %c0_i32_0 = arith.constant 0 : i32
    %c0_i32_1 = arith.constant 0 : i32
    return %c0_i32, %c0_i32_0 : i32, i32
  }
  func.func @transform_5(%arg0: i32) -> (i32, i32) {
    %c0_i32 = arith.constant 0 : i32
    %c0_i32_0 = arith.constant 0 : i32
    %c0_i32_1 = arith.constant 0 : i32
    return %c0_i32, %c0_i32_0 : i32, i32
  }
  func.func @transform_6(%arg0: i32) -> (i32, i32) {
    %c0_i32 = arith.constant 0 : i32
    %c0_i32_0 = arith.constant 0 : i32
    %c0_i32_1 = arith.constant 0 : i32
    return %c0_i32, %c0_i32_0 : i32, i32
  }
  func.func @transform_7(%arg0: i32) -> (i32, i32) {
    %c0_i32 = arith.constant 0 : i32
    %c0_i32_0 = arith.constant 0 : i32
    %c0_i32_1 = arith.constant 0 : i32
    return %c0_i32, %c0_i32_0 : i32, i32
  }
}

</mosaic_0001>

<bundles_post_ra>
// kernel: tpu_custom_call.1
= control target key start
LH: loop header
LB: loop body
LE: loop exit
PB: predicated region body
PF: predicated region fallthrough
CT: control target
= control target key end

     0   :  { %12 = vsyncpa [#allocation3], 0  ;;  %s1816_s0 = inlined_call_operand.hbm [shape: f32[8,128], index: 0, kind: input, shape index: {}]   ;;  %s1817_s1 = inlined_call_operand.hbm [shape: f32[8,128], index: 1, kind: input, shape index: {}]   ;;  %s1818_s2 = inlined_call_operand.hbm [shape: f32[8,128], index: 2, kind: input, shape index: {}]   ;;  %s1819_s3 = inlined_call_operand.hbm [shape: f32[128,128], index: 3, kind: input, shape index: {}]   ;;  %s1820_s4 = inlined_call_operand.hbm [shape: f32[384,384], index: 4, kind: input, shape index: {}]   ;;  %s1821_s5 = inlined_call_operand.vmem [shape: f32[1,384], index: 5, kind: input, shape index: {}]   ;;  %s1822_s6 = inlined_call_operand.vmem [shape: f32[1,384], index: 6, kind: input, shape index: {}]   ;;  %s1823_s7 = inlined_call_operand.hbm [shape: f32[8,384], index: 7, kind: output, shape index: {}]  }
   0x1   :  { %13 = vsyncpa [#allocation6], 0 }
   0x2   :  { %14 = vsyncpa [#allocation9], 0 }
   0x3   :  { %15 = vsyncpa [#allocation4], 0  ;;  %s1592_s24 = smov [#allocation5]   ;;  %s1593_s26 = smov [#allocation8]  }
   0x4   :  { %s32_s25 = sshll.u32 %s1592_s24, 4  ;;  %s51_s27 = sshll.u32 %s1593_s26, 4  ;;  %s33_s25 = int_to_ptr.vmem [resolvable:$true] %s32_s25  ;;  %s1645_s27 = int_to_ptr.vmem [resolvable:$true] %s51_s27 }
   0x5   :  { %s1452_s30 = scalar_lea.hbm %s1817_s1, 128 }
   0x6   :  { %p1453_p0 = scmp.ne.s32.totalorder %s1817_s1, %s1452_s30  ;;  %p1456_p1 = scmp.lt.u32.totalorder %s1452_s30, %s1817_s1 }
   0x8   :  { %p1458_p2 = pnand %p1456_p1, %p1453_p0 }
   0xa   :  { %1461 = shalt.err (!%p1458_p2)
}
   0xb   :  { %s1462_s12 = scalar_lea.vmem %s33_s25, 128  ;;  %p1467_p4 = scmp.lt.s32.totalorder %s33_s25, %s33_s25 }
   0xc   :  { %p1463_p3 = scmp.ne.s32.totalorder %s33_s25, %s1462_s12  ;;  %p1468_p5 = scmp.lt.s32.totalorder %s1462_s12, %s1462_s12 }
   0xe   :  { %p1469_p6 = por %p1468_p5, %p1467_p4 }
  0x10   :  { %p1470_p7 = pnand %p1469_p6, %p1463_p3 }
  0x12   :  { %1473 = shalt.err (!%p1470_p7)
}
  0x13   :  { %35 = dma.hbm_to_vmem [thread:$0]  %s1817_s1, 128, %s33_s25, [#allocation6]  }
  0x14   :  { %s1474_s17 = scalar_lea.hbm %s1819_s3, 2048 }
  0x15   :  { %p1475_p8 = scmp.ne.s32.totalorder %s1819_s3, %s1474_s17  ;;  %p1478_p9 = scmp.lt.u32.totalorder %s1474_s17, %s1819_s3 }
  0x17   :  { %p1480_p10 = pnand %p1478_p9, %p1475_p8 }
  0x19   :  { %1483 = shalt.err (!%p1480_p10)
}
  0x1a   :  { %s1484_s22 = scalar_lea.vmem %s1645_s27, 2048  ;;  %p1489_p12 = scmp.lt.s32.totalorder %s1645_s27, %s1645_s27 }
  0x1b   :  { %p1485_p11 = scmp.ne.s32.totalorder %s1645_s27, %s1484_s22  ;;  %p1490_p13 = scmp.lt.s32.totalorder %s1484_s22, %s1484_s22 }
  0x1d   :  { %p1491_p0 = por %p1490_p13, %p1489_p12 }
  0x1f   :  { %p1492_p1 = pnand %p1491_p0, %p1485_p11 }
  0x21   :  { %1495 = shalt.err (!%p1492_p1)
}
  0x22   :  { %s1594_s1 = smov 128   ;;  %s1595_s23 = smov 8  }
  0x23   :  { %57 = dma.hbm_to_vmem [thread:$0]  %s1819_s3, 2048, %s1645_s27, [#allocation9], %s1594_s1, %s1594_s1, %s1595_s23  }
  0x24   :  { %s1596_s26 = smov [#allocation2]   ;;  %s1597_s29 = smov [#allocation7]  }
  0x25   :  { %s22_s28 = sshll.u32 %s1596_s26, 4  ;;  %s42_s30 = sshll.u32 %s1597_s29, 4  ;;  %s23_s28 = int_to_ptr.vmem [resolvable:$true] %s22_s28  ;;  %s43_s30 = int_to_ptr.vmem [resolvable:$true] %s42_s30 }
  0x26   :  { %s1496_s10 = scalar_lea.hbm %s1816_s0, 128 }
  0x27   :  { %p1497_p2 = scmp.ne.s32.totalorder %s1816_s0, %s1496_s10  ;;  %p1500_p3 = scmp.lt.u32.totalorder %s1496_s10, %s1816_s0 }
  0x29   :  { %p1502_p4 = pnand %p1500_p3, %p1497_p2 }
  0x2b   :  { %1505 = shalt.err (!%p1502_p4)
}
  0x2c   :  { %s1506_s3 = scalar_lea.vmem %s23_s28, 128  ;;  %p1511_p6 = scmp.lt.s32.totalorder %s23_s28, %s23_s28 }
  0x2d   :  { %p1507_p5 = scmp.ne.s32.totalorder %s23_s28, %s1506_s3  ;;  %p1512_p7 = scmp.lt.s32.totalorder %s1506_s3, %s1506_s3 }
  0x2f   :  { %p1513_p8 = por %p1512_p7, %p1511_p6 }
  0x31   :  { %p1514_p9 = pnand %p1513_p8, %p1507_p5 }
  0x33   :  { %1517 = shalt.err (!%p1514_p9)
}
  0x34   :  { %25 = dma.hbm_to_vmem [thread:$0]  %s1816_s0, 128, %s23_s28, [#allocation3]  }
  0x35   :  { %s1518_s18 = scalar_lea.hbm %s1818_s2, 128 }
  0x36   :  { %p1519_p10 = scmp.ne.s32.totalorder %s1818_s2, %s1518_s18  ;;  %p1522_p11 = scmp.lt.u32.totalorder %s1518_s18, %s1818_s2 }
  0x38   :  { %p1524_p12 = pnand %p1522_p11, %p1519_p10 }
  0x3a   :  { %1527 = shalt.err (!%p1524_p12)
}
  0x3b   :  { %s1528_s1 = scalar_lea.vmem %s43_s30, 128  ;;  %p1533_p0 = scmp.lt.s32.totalorder %s43_s30, %s43_s30 }
  0x3c   :  { %p1529_p13 = scmp.ne.s32.totalorder %s43_s30, %s1528_s1  ;;  %p1534_p1 = scmp.lt.s32.totalorder %s1528_s1, %s1528_s1 }
  0x3e   :  { %p1535_p2 = por %p1534_p1, %p1533_p0 }
  0x40   :  { %p1536_p3 = pnand %p1535_p2, %p1529_p13 }
  0x42   :  { %1539 = shalt.err (!%p1536_p3)
}
  0x43   :  { %45 = dma.hbm_to_vmem [thread:$0]  %s1818_s2, 128, %s43_s30, [#allocation6]  }
  0x44   :  { %s1598_s24 = smov [#allocation10]   ;;  %s1540_s29 = scalar_lea.hbm %s1820_s4, 18432 }
  0x45   :  { %s63_s25 = sshll.u32 %s1598_s24, 4  ;;  %p1541_p4 = scmp.ne.s32.totalorder %s1820_s4, %s1540_s29  ;;  %s64_s25 = int_to_ptr.vmem [resolvable:$true] %s63_s25 }
  0x46   :  { %p1544_p5 = scmp.lt.u32.totalorder %s1540_s29, %s1820_s4 }
  0x48   :  { %p1546_p6 = pnand %p1544_p5, %p1541_p4 }
  0x4a   :  { %1549 = shalt.err (!%p1546_p6)
}
  0x4b   :  { %s1550_s12 = scalar_lea.vmem %s64_s25, 18432  ;;  %p1555_p8 = scmp.lt.s32.totalorder %s64_s25, %s64_s25 }
  0x4c   :  { %p1551_p7 = scmp.ne.s32.totalorder %s64_s25, %s1550_s12  ;;  %p1556_p9 = scmp.lt.s32.totalorder %s1550_s12, %s1550_s12 }
  0x4e   :  { %p1557_p10 = por %p1556_p9, %p1555_p8 }
  0x50   :  { %p1558_p11 = pnand %p1557_p10, %p1551_p7 }
  0x52   :  { %1561 = shalt.err (!%p1558_p11)
}
  0x53   :  { %s1599_s2 = smov 384   ;;  %s1600_s30 = smov 24  }
  0x54   :  { %69 = dma.hbm_to_vmem [thread:$0]  %s1820_s4, 18432, %s64_s25, [#allocation9], %s1599_s2, %s1599_s2, %s1600_s30  }
  0x55   :  { %1584 = dma.done.wait [#allocation3], 128  }
  0x56   :  { %1585 = vsyncadd [#allocation3], 4294967168 }
  0x57   :  { %1586 = dma.done.wait [#allocation6], 256  }
  0x58   :  { %1587 = vsyncadd [#allocation6], 4294967040 }
  0x59   :  { %1588 = dma.done.wait [#allocation9], 20480  }
  0x5a   :  { %1589 = vsyncadd [#allocation9], 4294946816  ;;  %v1601_v0 = vmov 0.0|0.0   ;;  %vm1602_vm0 = vmmov 0   ;;  %v1603_v1 = vmov 0.0   ;;  %v92_v2 = vld [vmem:[#allocation8] sm:$0xff] }
  0x5b   :  { %1237 = vmatprep.subr.bf16.mxu1 %v1601_v0  ;;  %1213 = vmatprep.subr.bf16.mxu0 %v1601_v0  ;;  %v93_v3 = vld [vmem:[#allocation8 + $0x8] sm:$0xff]  ;;  %v94_v4 = vld [vmem:[#allocation8 + $0x10] sm:$0xff]  ;;  %v95_v6 = vld [vmem:[#allocation8 + $0x18] sm:$0xff] }
  0x5c   :  { %1105 = vmatprep.mubr.msk.f32.mxu1 %vm1602_vm0, %v1603_v1  ;;  %1070 = vmatprep.mubr.msk.f32.mxu0 %vm1602_vm0, %v1603_v1  ;;  %v1214_v5 = vpack.c.bf16 %v93_v3, %v92_v2  ;;  %v1217_v7 = vpack.c.bf16 %v95_v6, %v94_v4  ;;  %v96_v8 = vld [vmem:[#allocation8 + $0x20] sm:$0xff]  ;;  %v97_v9 = vld [vmem:[#allocation8 + $0x28] sm:$0xff]  ;;  %v98_v11 = vld [vmem:[#allocation8 + $0x30] sm:$0xff] }
  0x5d   :  { %v1220_v10 = vpack.c.bf16 %v97_v9, %v96_v8  ;;  %v99_v12 = vld [vmem:[#allocation8 + $0x38] sm:$0xff]  ;;  %v100_v14 = vld [vmem:[#allocation8 + $0x40] sm:$0xff]  ;;  %v101_v15 = vld [vmem:[#allocation8 + $0x48] sm:$0xff] }
  0x5e   :  { %1239 = vmatpush3.bf16.msra.mxu1 %v1214_v5  ;;  %1215 = vmatpush3.bf16.msra.mxu0 %v1214_v5  ;;  %v1223_v13 = vpack.c.bf16 %v99_v12, %v98_v11  ;;  %v1226_v16 = vpack.c.bf16 %v101_v15, %v100_v14  ;;  %v102_v17 = vld [vmem:[#allocation8 + $0x50] sm:$0xff]  ;;  %v103_v18 = vld [vmem:[#allocation8 + $0x58] sm:$0xff]  ;;  %v104_v20 = vld [vmem:[#allocation8 + $0x60] sm:$0xff] }
  0x5f   :  { %1240 = vmatprep.subr.bf16.mxu1 %v1601_v0  ;;  %1216 = vmatprep.subr.bf16.mxu0 %v1601_v0  ;;  %v1229_v19 = vpack.c.bf16 %v103_v18, %v102_v17  ;;  %v105_v21 = vld [vmem:[#allocation8 + $0x68] sm:$0xff]  ;;  %v106_v23 = vld [vmem:[#allocation8 + $0x70] sm:$0xff]  ;;  %v107_v24 = vld [vmem:[#allocation8 + $0x78] sm:$0xff] }
  0x60   :  { %v1232_v22 = vpack.c.bf16 %v105_v21, %v104_v20  ;;  %v1235_v25 = vpack.c.bf16 %v107_v24, %v106_v23  ;;  %v1732_v26 = vld [vmem:[#allocation5] sm:$0xff]  ;;  %v1734_v27 = vld [vmem:[#allocation2] sm:$0xff]  ;;  %v364_v29 = vld [vmem:[#allocation10 + $0x1a0] sm:$0xff] }
  0x61   :  { %v361_v28 = vld [vmem:[#allocation10 + $0x188] sm:$0xff]  ;;  %v360_v31 = vld [vmem:[#allocation10 + $0x180] sm:$0xff]  ;;  %v363_v32 = vld [vmem:[#allocation10 + $0x198] sm:$0xff] }
  0x62   :  { %1242 = vmatpush3.bf16.msra.mxu1 %v1217_v7  ;;  %1218 = vmatpush3.bf16.msra.mxu0 %v1217_v7  ;;  %v1261_v30 = vpack.c.bf16 %v364_v29, %v361_v28  ;;  %v362_v33 = vld [vmem:[#allocation10 + $0x190] sm:$0xff]  ;;  %v1263_v34 = vpack.c.bf16 %v363_v32, %v360_v31  ;;  %v365_v35 = vld [vmem:[#allocation10 + $0x1a8] sm:$0xff]  ;;  %v367_v37 = vld [vmem:[#allocation10 + $0x1b8] sm:$0xff] }
  0x63   :  { %1243 = vmatprep.subr.bf16.mxu1 %v1601_v0  ;;  %1219 = vmatprep.subr.bf16.mxu0 %v1601_v0  ;;  %v1294_v36 = vpack.c.bf16 %v365_v35, %v362_v33  ;;  %v370_v38 = vld [vmem:[#allocation10 + $0x1d0] sm:$0xff]  ;;  %v369_v41 = vld [vmem:[#allocation10 + $0x1c8] sm:$0xff]  ;;  %v368_v42 = vld [vmem:[#allocation10 + $0x1c0] sm:$0xff] }
  0x64   :  { %v1265_v39 = vpack.c.bf16 %v370_v38, %v367_v37  ;;  %v366_v40 = vld [vmem:[#allocation10 + $0x1b0] sm:$0xff]  ;;  %v371_v44 = vld [vmem:[#allocation10 + $0x1d8] sm:$0xff]  ;;  %v373_v46 = vld [vmem:[#allocation10 + $0x1e8] sm:$0xff] }
  0x65   :  { %v1267_v43 = vpack.c.bf16 %v369_v41, %v366_v40  ;;  %v1297_v45 = vpack.c.bf16 %v371_v44, %v368_v42  ;;  %v376_v47 = vld [vmem:[#allocation10 + $0x200] sm:$0xff]  ;;  %v375_v50 = vld [vmem:[#allocation10 + $0x1f8] sm:$0xff]  ;;  %v374_v51 = vld [vmem:[#allocation10 + $0x1f0] sm:$0xff] }
  0x66   :  { %1245 = vmatpush3.bf16.msra.mxu1 %v1220_v10  ;;  %1221 = vmatpush3.bf16.msra.mxu0 %v1220_v10  ;;  %v1269_v48 = vpack.c.bf16 %v376_v47, %v373_v46  ;;  %v372_v49 = vld [vmem:[#allocation10 + $0x1e0] sm:$0xff]  ;;  %v377_v53 = vld [vmem:[#allocation10 + $0x208] sm:$0xff]  ;;  %v379_v55 = vld [vmem:[#allocation10 + $0x218] sm:$0xff] }
  0x67   :  { %1246 = vmatprep.subr.bf16.mxu1 %v1601_v0  ;;  %1222 = vmatprep.subr.bf16.mxu0 %v1601_v0  ;;  %v1271_v52 = vpack.c.bf16 %v375_v50, %v372_v49  ;;  %v1300_v54 = vpack.c.bf16 %v377_v53, %v374_v51  ;;  %v382_v56 = vld [vmem:[#allocation10 + $0x230] sm:$0xff]  ;;  %v381_v59 = vld [vmem:[#allocation10 + $0x228] sm:$0xff]  ;;  %v380_v60 = vld [vmem:[#allocation10 + $0x220] sm:$0xff] }
  0x68   :  { %v1273_v57 = vpack.c.bf16 %v382_v56, %v379_v55  ;;  %v378_v58 = vld [vmem:[#allocation10 + $0x210] sm:$0xff]  ;;  %v383_v62 = vld [vmem:[#allocation10 + $0x238] sm:$0xff]  ;;  %v385_v2 = vld [vmem:[#allocation10 + $0x248] sm:$0xff] }
  0x69   :  { %v1275_v61 = vpack.c.bf16 %v381_v59, %v378_v58  ;;  %v1303_v63 = vpack.c.bf16 %v383_v62, %v380_v60  ;;  %v388_v3 = vld [vmem:[#allocation10 + $0x260] sm:$0xff]  ;;  %v387_v6 = vld [vmem:[#allocation10 + $0x258] sm:$0xff]  ;;  %v386_v7 = vld [vmem:[#allocation10 + $0x250] sm:$0xff] }
  0x6a   :  { %1248 = vmatpush3.bf16.msra.mxu1 %v1223_v13  ;;  %1224 = vmatpush3.bf16.msra.mxu0 %v1223_v13  ;;  %v1277_v4 = vpack.c.bf16 %v388_v3, %v385_v2  ;;  %v384_v5 = vld [vmem:[#allocation10 + $0x240] sm:$0xff]  ;;  %v389_v9 = vld [vmem:[#allocation10 + $0x268] sm:$0xff]  ;;  %v391_v11 = vld [vmem:[#allocation10 + $0x278] sm:$0xff] }
  0x6b   :  { %1249 = vmatprep.subr.bf16.mxu1 %v1601_v0  ;;  %1225 = vmatprep.subr.bf16.mxu0 %v1601_v0  ;;  %v1279_v8 = vpack.c.bf16 %v387_v6, %v384_v5  ;;  %v1306_v10 = vpack.c.bf16 %v389_v9, %v386_v7  ;;  %v394_v12 = vld [vmem:[#allocation10 + $0x290] sm:$0xff]  ;;  %v393_v15 = vld [vmem:[#allocation10 + $0x288] sm:$0xff]  ;;  %v395_v18 = vld [vmem:[#allocation10 + $0x298] sm:$0xff] }
  0x6c   :  { %v1281_v13 = vpack.c.bf16 %v394_v12, %v391_v11  ;;  %v390_v14 = vld [vmem:[#allocation10 + $0x270] sm:$0xff]  ;;  %v397_v20 = vld [vmem:[#allocation10 + $0x2a8] sm:$0xff]  ;;  %v400_v21 = vld [vmem:[#allocation10 + $0x2c0] sm:$0xff] }
  0x6d   :  { %v1283_v17 = vpack.c.bf16 %v393_v15, %v390_v14  ;;  %v1285_v23 = vpack.c.bf16 %v400_v21, %v397_v20  ;;  %v399_v24 = vld [vmem:[#allocation10 + $0x2b8] sm:$0xff]  ;;  %v401_v28 = vld [vmem:[#allocation10 + $0x2c8] sm:$0xff]  ;;  %v406_v32 = vld [vmem:[#allocation10 + $0x2f0] sm:$0xff] }
  0x6e   :  { %1251 = vmatpush3.bf16.msra.mxu1 %v1226_v16  ;;  %1227 = vmatpush3.bf16.msra.mxu0 %v1226_v16  ;;  %v392_v16 = vld [vmem:[#allocation10 + $0x280] sm:$0xff]  ;;  %v403_v31 = vld [vmem:[#allocation10 + $0x2d8] sm:$0xff]  ;;  %v402_v33 = vld [vmem:[#allocation10 + $0x2d0] sm:$0xff] }
  0x6f   :  { %1252 = vmatprep.subr.bf16.mxu1 %v1601_v0  ;;  %1228 = vmatprep.subr.bf16.mxu0 %v1601_v0  ;;  %v405_v35 = vld [vmem:[#allocation10 + $0x2e8] sm:$0xff]  ;;  %v407_v37 = vld [vmem:[#allocation10 + $0x2f8] sm:$0xff]  ;;  %v314_v40 = vld [vmem:[#allocation10 + $0x20] sm:$0xff] }
  0x70   :  { %v1291_v38 = vpack.c.bf16 %v405_v35, %v402_v33  ;;  %v317_v20 = vld [vmem:[#allocation10 + $0x38] sm:$0xff]  ;;  %v320_v21 = vld [vmem:[#allocation10 + $0x50] sm:$0xff]  ;;  %v319_v33 = vld [vmem:[#allocation10 + $0x48] sm:$0xff] }
  0x71   :  { %v321_v35 = vld [vmem:[#allocation10 + $0x58] sm:$0xff] }
  0x72   :  { %1254 = vmatpush3.bf16.msra.mxu1 %v1229_v19  ;;  %1230 = vmatpush3.bf16.msra.mxu0 %v1229_v19  ;;  %v1309_v19 = vpack.c.bf16 %v395_v18, %v392_v16  ;;  %v310_v16 = vld [vmem:[#allocation10] sm:$0xff]  ;;  %v312_v18 = vld [vmem:[#allocation10 + $0x10] sm:$0xff] }
  0x73   :  { %1255 = vmatprep.subr.bf16.mxu1 %v1601_v0  ;;  %1231 = vmatprep.subr.bf16.mxu0 %v1601_v0 }
  0x76   :  { %1257 = vmatpush3.bf16.msra.mxu1 %v1232_v22  ;;  %1233 = vmatpush3.bf16.msra.mxu0 %v1232_v22  ;;  %v396_v22 = vld [vmem:[#allocation10 + $0x2a0] sm:$0xff] }
  0x77   :  { %1258 = vmatprep.subr.bf16.mxu1 %v1601_v0  ;;  %1234 = vmatprep.subr.bf16.mxu0 %v1601_v0  ;;  %v1287_v29 = vpack.c.bf16 %v399_v24, %v396_v22 }
  0x7a   :  { %1260 = vmatpush3.bf16.msra.mxu1 %v1235_v25  ;;  %1236 = vmatpush3.bf16.msra.mxu0 %v1235_v25  ;;  %v398_v25 = vld [vmem:[#allocation10 + $0x2b0] sm:$0xff] }
  0x7b   :  { %1293 = vmatprep.subr.bf16.mxu1 %v1601_v0  ;;  %1262 = vmatprep.subr.bf16.mxu0 %v1261_v30  ;;  %v1312_v30 = vpack.c.bf16 %v401_v28, %v398_v25 }
  0x7d   :  { %1106 = vmatmul.mubr.f32.vlgmr.msra.gmra.mrb[0].mxu1 %v1732_v26  ;;  %1071 = vmatmul.mubr.f32.vlgmr.msra.gmra.mrb[0].mxu0 %v1734_v27 }
  0x7e   :  { %472 = vmatprep.mubr.f32.mxu0 %v1603_v1  ;;  %1140 = vmatprep.mubr.msk.f32.mxu1 %vm1602_vm0, %v1603_v1 }
  0x7f   :  { %1264 = vmatpush1.bf16.msra.mxu0 %v1263_v34  ;;  %1295 = vmatpush3.bf16.msra.mxu1 %v1294_v36  ;;  %v1289_v34 = vpack.c.bf16 %v406_v32, %v403_v31  ;;  %v404_v36 = vld [vmem:[#allocation10 + $0x2e0] sm:$0xff]  ;;  %v1321_v32 = vpack.c.bf16 %v320_v21, %v317_v20  ;;  %v343_v20 = vld [vmem:[#allocation10 + $0x108] sm:$0xff] }
  0x80   :  { %1296 = vmatprep.subr.bf16.mxu1 %v1601_v0  ;;  %1266 = vmatprep.subr.bf16.mxu0 %v1265_v39  ;;  %v311_v39 = vld [vmem:[#allocation10 + $0x8] sm:$0xff]  ;;  %v1315_v41 = vpack.c.bf16 %v407_v37, %v404_v36  ;;  %v326_v37 = vld [vmem:[#allocation10 + $0x80] sm:$0xff] }
  0x81   :  { %v1317_v42 = vpack.c.bf16 %v314_v40, %v311_v39  ;;  %v323_v36 = vld [vmem:[#allocation10 + $0x68] sm:$0xff]  ;;  %v342_v21 = vld [vmem:[#allocation10 + $0x100] sm:$0xff] }
  0x83   :  { %1268 = vmatpush1.bf16.msra.mxu0 %v1267_v43  ;;  %1298 = vmatpush3.bf16.msra.mxu1 %v1297_v45 }
  0x84   :  { %1299 = vmatprep.subr.bf16.mxu1 %v1601_v0  ;;  %1270 = vmatprep.subr.bf16.mxu0 %v1269_v48 }
  0x87   :  { %1272 = vmatpush1.bf16.msra.mxu0 %v1271_v52  ;;  %1301 = vmatpush3.bf16.msra.mxu1 %v1300_v54 }
  0x88   :  { %1302 = vmatprep.subr.bf16.mxu1 %v1601_v0  ;;  %1274 = vmatprep.subr.bf16.mxu0 %v1273_v57 }
  0x8b   :  { %1276 = vmatpush1.bf16.msra.mxu0 %v1275_v61  ;;  %1304 = vmatpush3.bf16.msra.mxu1 %v1303_v63 }
  0x8c   :  { %1305 = vmatprep.subr.bf16.mxu1 %v1601_v0  ;;  %1278 = vmatprep.subr.bf16.mxu0 %v1277_v4 }
  0x8f   :  { %1280 = vmatpush1.bf16.msra.mxu0 %v1279_v8  ;;  %1307 = vmatpush3.bf16.msra.mxu1 %v1306_v10 }
  0x90   :  { %1308 = vmatprep.subr.bf16.mxu1 %v1601_v0  ;;  %1282 = vmatprep.subr.bf16.mxu0 %v1281_v13 }
  0x93   :  { %1284 = vmatpush1.bf16.msra.mxu0 %v1283_v17  ;;  %1310 = vmatpush3.bf16.msra.mxu1 %v1309_v19  ;;  %v313_v17 = vld [vmem:[#allocation10 + $0x18] sm:$0xff]  ;;  %v315_v19 = vld [vmem:[#allocation10 + $0x28] sm:$0xff] }
  0x94   :  { %1311 = vmatprep.subr.bf16.mxu1 %v1601_v0  ;;  %1286 = vmatprep.subr.bf16.mxu0 %v1285_v23  ;;  %v1319_v28 = vpack.c.bf16 %v313_v17, %v310_v16 }
  0x97   :  { %1288 = vmatpush1.bf16.msra.mxu0 %v1287_v29  ;;  %1313 = vmatpush3.bf16.msra.mxu1 %v1312_v30  ;;  %v1350_v29 = vpack.c.bf16 %v315_v19, %v312_v18  ;;  %v316_v30 = vld [vmem:[#allocation10 + $0x30] sm:$0xff] }
  0x98   :  { %1290 = vmatprep.subr.bf16.mxu0 %v1289_v34  ;;  %1314 = vmatprep.subr.bf16.mxu1 %v1601_v0  ;;  %v318_v34 = vld [vmem:[#allocation10 + $0x40] sm:$0xff]  ;;  %v340_v18 = vld [vmem:[#allocation10 + $0xf0] sm:$0xff] }
  0x9b   :  { %1292 = vmatpush1.bf16.msra.mxu0 %v1291_v38  ;;  %1316 = vmatpush3.bf16.msra.mxu1 %v1315_v41  ;;  %v1758_v38 = vld [vmem:[#allocation7] sm:$0xff]  ;;  %v1323_v41 = vpack.c.bf16 %v319_v33, %v316_v30  ;;  %v1339_v30 = vpack.c.bf16 %v343_v20, %v340_v18  ;;  %v706_v20 = vld [vmem:[#allocation10 + $0x370] sm:$0xff] }
  0x9c   :  { %1318 = vmatprep.subr.bf16.mxu0 %v1317_v42  ;;  %1349 = vmatprep.subr.bf16.mxu1 %v1601_v0  ;;  %v1353_v42 = vpack.c.bf16 %v321_v35, %v318_v34  ;;  %v349_v34 = vld [vmem:[#allocation10 + $0x138] sm:$0xff]  ;;  %v348_v35 = vld [vmem:[#allocation10 + $0x130] sm:$0xff] }
 0x150   :  { %v244_v43 = vpop.f32.mrb[0].mxu1  ;;  %v1750_v44 = vpop.f32.mrb[0].mxu0 }
 0x151   :  { %v268_v45 = vrot.slane %v244_v43, 4  ;;  %v275_v46 = vmul.f32 %v244_v43, %v244_v43  ;;  %v1107_v47 = vpop.f32.mrb[1].mxu1  ;;  %v1072_v48 = vpop.f32.mrb[1].mxu0  ;;  %v248_v57 = vrot.slane %v1750_v44, 4  ;;  %v255_v58 = vmul.f32 %v1750_v44, %v1750_v44 }
 0x152   :  { %v324_v47 = vld [vmem:[#allocation10 + $0x70] sm:$0xff]  ;;  %v327_v48 = vld [vmem:[#allocation10 + $0x88] sm:$0xff] }
 0x153   :  { %v269_v49 = vadd.f32 %v268_v45, %v244_v43  ;;  %v276_v50 = vrot.slane %v275_v46, 4  ;;  %v249_v63 = vadd.f32 %v248_v57, %v1750_v44  ;;  %v256_v2 = vrot.slane %v255_v58, 4 }
 0x154   :  { %v1325_v45 = vpack.c.bf16 %v326_v37, %v323_v36  ;;  %v351_v36 = vld [vmem:[#allocation10 + $0x148] sm:$0xff]  ;;  %v353_v37 = vld [vmem:[#allocation10 + $0x158] sm:$0xff] }
 0x155   :  { %v270_v51 = vrot.slane %v269_v49, 2  ;;  %v277_v52 = vadd.f32 %v276_v50, %v275_v46  ;;  %v250_v6 = vrot.slane %v249_v63, 2  ;;  %v257_v7 = vadd.f32 %v256_v2, %v255_v58  ;;  %v325_v46 = vld [vmem:[#allocation10 + $0x78] sm:$0xff]  ;;  %v332_v50 = vld [vmem:[#allocation10 + $0xb0] sm:$0xff]  ;;  %v331_v58 = vld [vmem:[#allocation10 + $0xa8] sm:$0xff] }
 0x157   :  { %v271_v53 = vadd.f32 %v270_v51, %v269_v49  ;;  %v278_v54 = vrot.slane %v277_v52, 2  ;;  %v251_v10 = vadd.f32 %v250_v6, %v249_v63  ;;  %v258_v11 = vrot.slane %v257_v7, 2  ;;  %v329_v49 = vld [vmem:[#allocation10 + $0x98] sm:$0xff]  ;;  %v334_v6 = vld [vmem:[#allocation10 + $0xc0] sm:$0xff] }
 0x158   :  { %v288_v51 = vrot.slane %v1758_v38, 4  ;;  %v1329_v57 = vpack.c.bf16 %v332_v50, %v329_v49  ;;  %v357_v49 = vld [vmem:[#allocation10 + $0x178] sm:$0xff]  ;;  %v693_v50 = vld [vmem:[#allocation10 + $0x308] sm:$0xff] }
 0x159   :  { %v272_v55 = vrot.slane %v271_v53, 1  ;;  %v279_v56 = vadd.f32 %v278_v54, %v277_v52  ;;  %v252_v12 = vrot.slane %v251_v10, 1  ;;  %v259_v13 = vadd.f32 %v258_v11, %v257_v7  ;;  %v341_v11 = vld [vmem:[#allocation10 + $0xf8] sm:$0xff] }
 0x15a   :  { %v295_v52 = vmul.f32 %v1758_v38, %v1758_v38  ;;  %v289_v63 = vadd.f32 %v288_v51, %v1758_v38  ;;  %v696_v51 = vld [vmem:[#allocation10 + $0x320] sm:$0xff] }
 0x15b   :  { %v273_v59 = vadd.f32 %v272_v55, %v271_v53  ;;  %v280_v60 = vrot.slane %v279_v56, 1  ;;  %v253_v14 = vadd.f32 %v252_v12, %v251_v10  ;;  %v260_v15 = vrot.slane %v259_v13, 1  ;;  %v339_v10 = vld [vmem:[#allocation10 + $0xe8] sm:$0xff]  ;;  %v344_v12 = vld [vmem:[#allocation10 + $0x110] sm:$0xff] }
 0x15c   :  { %v1356_v55 = vpack.c.bf16 %v327_v48, %v324_v47  ;;  %v296_v2 = vrot.slane %v295_v52, 4  ;;  %v1337_v19 = vpack.c.bf16 %v344_v12, %v341_v11  ;;  %v355_v47 = vld [vmem:[#allocation10 + $0x168] sm:$0xff]  ;;  %v354_v48 = vld [vmem:[#allocation10 + $0x160] sm:$0xff] }
 0x15d   :  { %v274_v61 = vmul.f32 0.125, %v273_v59  ;;  %v281_v62 = vadd.f32 %v280_v60, %v279_v56  ;;  %v1756_v24 = vmul.f32 0.125, %v253_v14  ;;  %v261_v25 = vadd.f32 %v260_v15, %v259_v13  ;;  %v328_v56 = vld [vmem:[#allocation10 + $0x90] sm:$0xff]  ;;  %v330_v59 = vld [vmem:[#allocation10 + $0xa0] sm:$0xff]  ;;  %v333_v60 = vld [vmem:[#allocation10 + $0xb8] sm:$0xff] }
 0x15e   :  { %v290_v13 = vrot.slane %v289_v63, 2  ;;  %v297_v14 = vadd.f32 %v296_v2, %v295_v52  ;;  %v702_v2 = vld [vmem:[#allocation10 + $0x350] sm:$0xff]  ;;  %v705_v11 = vld [vmem:[#allocation10 + $0x368] sm:$0xff]  ;;  %v708_v12 = vld [vmem:[#allocation10 + $0x380] sm:$0xff] }
 0x15f   :  { %v282_v3 = vmul.f32 0.125, %v281_v62  ;;  %v283_v4 = vmul.f32 %v274_v61, %v274_v61  ;;  %v358_v22 = vsub.f32 %v244_v43, %v274_v61  ;;  %v262_v39 = vmul.f32 0.125, %v261_v25  ;;  %v322_v43 = vld [vmem:[#allocation10 + $0x60] sm:$0xff]  ;;  %v335_v61 = vld [vmem:[#allocation10 + $0xc8] sm:$0xff] }
 0x160   :  { %v263_v40 = vmul.f32 %v1756_v24, %v1756_v24  ;;  %v1327_v54 = vpack.c.bf16 %v325_v46, %v322_v43  ;;  %v338_v62 = vld [vmem:[#allocation10 + $0xe0] sm:$0xff]  ;;  %v1368_v43 = vpack.c.bf16 %v351_v36, %v348_v35  ;;  %v1381_v18 = vpack.c.bf16 %v708_v12, %v705_v11  ;;  %v717_v35 = vld [vmem:[#allocation10 + $0x3c8] sm:$0xff] }
 0x161   :  { %v284_v5 = vsub.f32 %v282_v3, %v283_v4  ;;  %v1331_v4 = vpack.c.bf16 %v331_v58, %v328_v56  ;;  %v1333_v7 = vpack.c.bf16 %v338_v62, %v335_v61  ;;  %v350_v25 = vld [vmem:[#allocation10 + $0x140] sm:$0xff]  ;;  %v1373_v58 = vpack.c.bf16 %v696_v51, %v693_v50  ;;  %v697_v61 = vld [vmem:[#allocation10 + $0x328] sm:$0xff]  ;;  %v722_v51 = vld [vmem:[#allocation10 + $0x3f0] sm:$0xff] }
 0x162   :  { %v264_v53 = vsub.f32 %v262_v39, %v263_v40  ;;  %v356_v39 = vld [vmem:[#allocation10 + $0x170] sm:$0xff]  ;;  %v692_v56 = vld [vmem:[#allocation10 + $0x300] sm:$0xff] }
 0x163   :  { %v285_v8 = vmax.f32 %v284_v5, 0.0  ;;  %v1359_v5 = vpack.c.bf16 %v333_v60, %v330_v59  ;;  %v1345_v46 = vpack.c.bf16 %v356_v39, %v353_v37  ;;  %v695_v59 = vld [vmem:[#allocation10 + $0x318] sm:$0xff]  ;;  %v694_v60 = vld [vmem:[#allocation10 + $0x310] sm:$0xff]  ;;  %v720_v36 = vld [vmem:[#allocation10 + $0x3e0] sm:$0xff] }
 0x164   :  { %v265_v3 = vmax.f32 %v264_v53, 0.0 }
 0x165   :  { %v286_v9 = vadd.f32 1e-05, %v285_v8  ;;  %v337_v8 = vld [vmem:[#allocation10 + $0xd8] sm:$0xff] }
 0x166   :  { %v266_v15 = vadd.f32 1e-05, %v265_v3  ;;  %v1335_v16 = vpack.c.bf16 %v337_v8, %v334_v6  ;;  %v1406_v6 = vpack.c.bf16 %v697_v61, %v694_v60  ;;  %v728_v60 = vld [vmem:[#allocation10 + $0x420] sm:$0xff] }
 0x167   :  { %1446 = vrsqrt.f32 %v286_v9  ;;  %v336_v9 = vld [vmem:[#allocation10 + $0xd0] sm:$0xff] }
 0x168   :  { %v1362_v17 = vpack.c.bf16 %v339_v10, %v336_v9  ;;  %1448 = vrsqrt.f32 %v266_v15  ;;  %v700_v9 = vld [vmem:[#allocation10 + $0x340] sm:$0xff]  ;;  %v703_v10 = vld [vmem:[#allocation10 + $0x358] sm:$0xff] }
 0x171   :  { %v1447_v23 = vpop.eup %1446 }
 0x172   :  { %v359_v31 = vmul.f32 %v1447_v23, %v358_v22  ;;  %v345_v22 = vld [vmem:[#allocation10 + $0x118] sm:$0xff]  ;;  %v347_v23 = vld [vmem:[#allocation10 + $0x128] sm:$0xff]  ;;  %v1449_v62 = vpop.eup %1448 }
 0x173   :  { %v1341_v33 = vpack.c.bf16 %v350_v25, %v347_v23  ;;  %v714_v23 = vld [vmem:[#allocation10 + $0x3b0] sm:$0xff] }
 0x174   :  { %473 = vmatmul.mubr.f32.vlgmr.msra.gmra.mrb[2].mxu0 %v359_v31  ;;  %1141 = vmatmul.mubr.f32.vlgmr.msra.gmra.mrb[2].mxu1 %v359_v31  ;;  %v1365_v31 = vpack.c.bf16 %v345_v22, %v342_v21  ;;  %v709_v21 = vld [vmem:[#allocation10 + $0x388] sm:$0xff]  ;;  %v711_v22 = vld [vmem:[#allocation10 + $0x398] sm:$0xff] }
 0x175   :  { %1320 = vmatpush1.bf16.msra.mxu0 %v1319_v28  ;;  %1351 = vmatpush3.bf16.msra.mxu1 %v1350_v29  ;;  %v291_v28 = vadd.f32 %v290_v13, %v289_v63  ;;  %v298_v29 = vrot.slane %v297_v14, 2  ;;  %v699_v63 = vld [vmem:[#allocation10 + $0x338] sm:$0xff] }
 0x176   :  { %1322 = vmatprep.subr.bf16.mxu0 %v1321_v32  ;;  %1352 = vmatprep.subr.bf16.mxu1 %v1601_v0  ;;  %v346_v32 = vld [vmem:[#allocation10 + $0x120] sm:$0xff] }
 0x177   :  { %613 = vmatprep.mubr.f32.mxu0 %v1603_v1  ;;  %1175 = vmatprep.mubr.msk.f32.mxu1 %vm1602_vm0, %v1603_v1  ;;  %v292_v40 = vrot.slane %v291_v28, 1 }
 0x179   :  { %1324 = vmatpush1.bf16.msra.mxu0 %v1323_v41  ;;  %1354 = vmatpush3.bf16.msra.mxu1 %v1353_v42  ;;  %v299_v41 = vadd.f32 %v298_v29, %v297_v14  ;;  %v1343_v42 = vpack.c.bf16 %v349_v34, %v346_v32  ;;  %v293_v52 = vadd.f32 %v292_v40, %v291_v28  ;;  %v713_v32 = vld [vmem:[#allocation10 + $0x3a8] sm:$0xff]  ;;  %v715_v34 = vld [vmem:[#allocation10 + $0x3b8] sm:$0xff]  ;;  %v716_v40 = vld [vmem:[#allocation10 + $0x3c0] sm:$0xff] }
 0x17a   :  { %1326 = vmatprep.subr.bf16.mxu0 %v1325_v45  ;;  %1355 = vmatprep.subr.bf16.mxu1 %v1601_v0  ;;  %v352_v45 = vld [vmem:[#allocation10 + $0x150] sm:$0xff]  ;;  %v1412_v29 = vpack.c.bf16 %v709_v21, %v706_v20  ;;  %v886_v21 = vlaneseq }
 0x17b   :  { %v300_v53 = vrot.slane %v299_v41, 1  ;;  %v1778_v3 = vmul.f32 0.125, %v293_v52 }
 0x17d   :  { %1328 = vmatpush1.bf16.msra.mxu0 %v1327_v54  ;;  %1357 = vmatpush3.bf16.msra.mxu1 %v1356_v55  ;;  %v1347_v54 = vpack.c.bf16 %v355_v47, %v352_v45  ;;  %v1371_v55 = vpack.c.bf16 %v357_v49, %v354_v48  ;;  %v303_v14 = vmul.f32 %v1778_v3, %v1778_v3  ;;  %v721_v45 = vld [vmem:[#allocation10 + $0x3e8] sm:$0xff]  ;;  %v726_v47 = vld [vmem:[#allocation10 + $0x410] sm:$0xff] }
 0x17e   :  { %1330 = vmatprep.subr.bf16.mxu0 %v1329_v57  ;;  %1358 = vmatprep.subr.bf16.mxu1 %v1601_v0  ;;  %v308_v57 = vsub.f32 %v1750_v44, %v1756_v24  ;;  %v1377_v44 = vpack.c.bf16 %v702_v2, %v699_v63  ;;  %v701_v24 = vld [vmem:[#allocation10 + $0x348] sm:$0xff]  ;;  %v730_v63 = vld [vmem:[#allocation10 + $0x430] sm:$0xff]  ;;  %v690_v11 = vsub.f32 %v1758_v38, %v1778_v3  ;;  %v887_v3 = vshrl.u32 %v886_v21, 7 }
 0x17f   :  { %v733_v2 = vld [vmem:[#allocation10 + $0x448] sm:$0xff] }
 0x180   :  { %v309_v8 = vmul.f32 %v1449_v62, %v308_v57  ;;  %v732_v57 = vld [vmem:[#allocation10 + $0x440] sm:$0xff]  ;;  %v731_v62 = vld [vmem:[#allocation10 + $0x438] sm:$0xff] }
 0x181   :  { %1332 = vmatpush1.bf16.msra.mxu0 %v1331_v4  ;;  %1360 = vmatpush3.bf16.msra.mxu1 %v1359_v5  ;;  %v301_v4 = vadd.f32 %v300_v53, %v299_v41  ;;  %v1375_v5 = vpack.c.bf16 %v695_v59, %v692_v56  ;;  %v1389_v41 = vpack.c.bf16 %v720_v36, %v717_v35  ;;  %v725_v53 = vld [vmem:[#allocation10 + $0x408] sm:$0xff] }
 0x182   :  { %1334 = vmatprep.subr.bf16.mxu0 %v1333_v7  ;;  %1361 = vmatprep.subr.bf16.mxu1 %v1601_v0  ;;  %v698_v7 = vld [vmem:[#allocation10 + $0x330] sm:$0xff]  ;;  %v729_v56 = vld [vmem:[#allocation10 + $0x428] sm:$0xff] }
 0x183   :  { %v302_v13 = vmul.f32 0.125, %v301_v4  ;;  %v1379_v15 = vpack.c.bf16 %v701_v24, %v698_v7  ;;  %v1397_v61 = vpack.c.bf16 %v732_v57, %v729_v56  ;;  %v735_v4 = vld [vmem:[#allocation10 + $0x458] sm:$0xff]  ;;  %v1424_v7 = vpack.c.bf16 %v733_v2, %v730_v63  ;;  %v737_v24 = vld [vmem:[#allocation10 + $0x468] sm:$0xff] }
 0x185   :  { %1336 = vmatpush1.bf16.msra.mxu0 %v1335_v16  ;;  %1363 = vmatpush3.bf16.msra.mxu1 %v1362_v17  ;;  %v1409_v16 = vpack.c.bf16 %v703_v10, %v700_v9  ;;  %v704_v17 = vld [vmem:[#allocation10 + $0x360] sm:$0xff]  ;;  %v304_v25 = vsub.f32 %v302_v13, %v303_v14  ;;  %v739_v10 = vld [vmem:[#allocation10 + $0x478] sm:$0xff] }
 0x186   :  { %1338 = vmatprep.subr.bf16.mxu0 %v1337_v19  ;;  %1364 = vmatprep.subr.bf16.mxu1 %v1601_v0  ;;  %v707_v19 = vld [vmem:[#allocation10 + $0x378] sm:$0xff]  ;;  %v736_v9 = vld [vmem:[#allocation10 + $0x460] sm:$0xff] }
 0x187   :  { %v1383_v28 = vpack.c.bf16 %v707_v19, %v704_v17  ;;  %v305_v37 = vmax.f32 %v304_v25, 0.0  ;;  %v1427_v14 = vpack.c.bf16 %v739_v10, %v736_v9  ;;  %v892_v25 = vsub.s32 1, %v887_v3 }
 0x189   :  { %1340 = vmatpush1.bf16.msra.mxu0 %v1339_v30  ;;  %1366 = vmatpush3.bf16.msra.mxu1 %v1365_v31  ;;  %v710_v30 = vld [vmem:[#allocation10 + $0x390] sm:$0xff]  ;;  %v1385_v31 = vpack.c.bf16 %v714_v23, %v711_v22  ;;  %v306_v48 = vadd.f32 1e-05, %v305_v37  ;;  %v888_v22 = vsub.s32 0, %v887_v3  ;;  %v884_v23 = vld [vmem:[%s1821_s5] sm:$0x7] }
 0x18a   :  { %1342 = vmatprep.subr.bf16.mxu0 %v1341_v33  ;;  %1367 = vmatprep.subr.bf16.mxu1 %v1601_v0  ;;  %v712_v33 = vld [vmem:[#allocation10 + $0x3a0] sm:$0xff]  ;;  %v1387_v39 = vpack.c.bf16 %v713_v32, %v710_v30  ;;  %v893_v30 = vrot.slane %v884_v23, %v892_v25  ;;  %s1604_s5 = smov [#allocation11]  }
 0x18b   :  { %1450 = vrsqrt.f32 %v306_v48 }
 0x18d   :  { %1344 = vmatpush1.bf16.msra.mxu0 %v1343_v42  ;;  %1369 = vmatpush3.bf16.msra.mxu1 %v1368_v43  ;;  %v719_v42 = vld [vmem:[#allocation10 + $0x3d8] sm:$0xff]  ;;  %v718_v43 = vld [vmem:[#allocation10 + $0x3d0] sm:$0xff] }
 0x18e   :  { %1346 = vmatprep.subr.bf16.mxu0 %v1345_v46  ;;  %1370 = vmatprep.subr.bf16.mxu1 %v1601_v0  ;;  %v723_v46 = vld [vmem:[#allocation10 + $0x3f8] sm:$0xff]  ;;  %v1391_v49 = vpack.c.bf16 %v719_v42, %v716_v40  ;;  %v1418_v50 = vpack.c.bf16 %v721_v45, %v718_v43 }
 0x18f   :  { %v1393_v52 = vpack.c.bf16 %v726_v47, %v723_v46 }
 0x191   :  { %1348 = vmatpush1.bf16.msra.mxu0 %v1347_v54  ;;  %1372 = vmatpush3.bf16.msra.mxu1 %v1371_v55  ;;  %v724_v54 = vld [vmem:[#allocation10 + $0x400] sm:$0xff]  ;;  %v727_v55 = vld [vmem:[#allocation10 + $0x418] sm:$0xff] }
 0x192   :  { %1374 = vmatprep.subr.bf16.mxu0 %v1373_v58  ;;  %1405 = vmatprep.subr.bf16.mxu1 %v1601_v0  ;;  %v1395_v58 = vpack.c.bf16 %v725_v53, %v722_v51  ;;  %v1421_v59 = vpack.c.bf16 %v727_v55, %v724_v54 }
 0x194   :  { %614 = vmatmul.mubr.f32.vlgmr.msra.gmra.mrb[2].mxu0 %v309_v8  ;;  %1176 = vmatmul.mubr.f32.vlgmr.msra.gmra.mrb[4].mxu1 %v309_v8  ;;  %v734_v8 = vld [vmem:[#allocation10 + $0x450] sm:$0xff] }
 0x195   :  { %1376 = vmatpush1.bf16.msra.mxu0 %v1375_v5  ;;  %1407 = vmatpush3.bf16.msra.mxu1 %v1406_v6  ;;  %v738_v5 = vld [vmem:[#allocation10 + $0x470] sm:$0xff]  ;;  %v1399_v6 = vpack.c.bf16 %v731_v62, %v728_v60  ;;  %v1451_v12 = vpop.eup %1450  ;;  %v1403_v13 = vpack.c.bf16 %v737_v24, %v734_v8 }
 0x196   :  { %1378 = vmatprep.subr.bf16.mxu0 %v1377_v44  ;;  %1408 = vmatprep.subr.bf16.mxu1 %v1601_v0  ;;  %v1401_v44 = vpack.c.bf16 %v738_v5, %v735_v4 }
 0x197   :  { %804 = vmatprep.mubr.f32.mxu0 %v1603_v1  ;;  %1210 = vmatprep.mubr.msk.f32.mxu1 %vm1602_vm0, %v1603_v1  ;;  %v1415_v1 = vpack.c.bf16 %v715_v34, %v712_v33 }
 0x199   :  { %1380 = vmatpush1.bf16.msra.mxu0 %v1379_v15  ;;  %1410 = vmatpush3.bf16.msra.mxu1 %v1409_v16  ;;  %v691_v15 = vmul.f32 %v1451_v12, %v690_v11 }
 0x19a   :  { %1382 = vmatprep.subr.bf16.mxu0 %v1381_v18  ;;  %1411 = vmatprep.subr.bf16.mxu1 %v1601_v0 }
 0x19d   :  { %1384 = vmatpush1.bf16.msra.mxu0 %v1383_v28  ;;  %1413 = vmatpush3.bf16.msra.mxu1 %v1412_v29  ;;  %v896_v28 = vsub.s32 2, %v887_v3  ;;  %v889_v29 = vrot.slane %v884_v23, %v888_v22 }
 0x19e   :  { %1386 = vmatprep.subr.bf16.mxu0 %v1385_v31  ;;  %1414 = vmatprep.subr.bf16.mxu1 %v1601_v0 }
 0x19f   :  { %v897_v32 = vrot.slane %v884_v23, %v896_v28 }
 0x1a1   :  { %1388 = vmatpush1.bf16.msra.mxu0 %v1387_v39  ;;  %1416 = vmatpush3.bf16.msra.mxu1 %v1415_v1 }
 0x1a2   :  { %1390 = vmatprep.subr.bf16.mxu0 %v1389_v41  ;;  %1417 = vmatprep.subr.bf16.mxu1 %v1601_v0 }
 0x1a5   :  { %1392 = vmatpush1.bf16.msra.mxu0 %v1391_v49  ;;  %1419 = vmatpush3.bf16.msra.mxu1 %v1418_v50 }
 0x1a6   :  { %1394 = vmatprep.subr.bf16.mxu0 %v1393_v52  ;;  %1420 = vmatprep.subr.bf16.mxu1 %v1601_v0 }
 0x1a9   :  { %1396 = vmatpush1.bf16.msra.mxu0 %v1395_v58  ;;  %1422 = vmatpush3.bf16.msra.mxu1 %v1421_v59 }
 0x1aa   :  { %1398 = vmatprep.subr.bf16.mxu0 %v1397_v61  ;;  %1423 = vmatprep.subr.bf16.mxu1 %v1601_v0 }
 0x1ad   :  { %1400 = vmatpush1.bf16.msra.mxu0 %v1399_v6  ;;  %1425 = vmatpush3.bf16.msra.mxu1 %v1424_v7 }
 0x1ae   :  { %1402 = vmatprep.subr.bf16.mxu0 %v1401_v44  ;;  %1426 = vmatprep.subr.bf16.mxu1 %v1601_v0  ;;  %v907_v0 = vld [vmem:[%s1822_s6] sm:$0x7]  ;;  %s942_s6 = sshll.u32 %s1604_s5, 4  ;;  %s943_s6 = int_to_ptr.vmem [resolvable:$true] %s942_s6 }
 0x1af   :  { %v912_v31 = vrot.slane %v907_v0, %v888_v22  ;;  %v916_v35 = vrot.slane %v907_v0, %v892_v25  ;;  %v920_v39 = vrot.slane %v907_v0, %v896_v28  ;;  %s1562_s16 = scalar_lea.vmem %s943_s6, 384  ;;  %p1567_p13 = scmp.lt.s32.totalorder %s943_s6, %s943_s6 }
 0x1b0   :  { %p1563_p12 = scmp.ne.s32.totalorder %s943_s6, %s1562_s16  ;;  %p1568_p0 = scmp.lt.s32.totalorder %s1562_s16, %s1562_s16 }
 0x1b1   :  { %1404 = vmatpush1.bf16.msra.mxu0 %v1403_v13  ;;  %1428 = vmatpush3.bf16.msra.mxu1 %v1427_v14 }
 0x1b2   :  { %p1569_p1 = por %p1568_p0, %p1567_p13 }
 0x1b4   :  { %805 = vmatmul.mubr.f32.vlgmr.msra.gmra.mrb[2].mxu0 %v691_v15  ;;  %1211 = vmatmul.mubr.f32.vlgmr.msra.gmra.mrb[6].mxu1 %v691_v15  ;;  %p1570_p2 = pnand %p1569_p1, %p1563_p12 }
 0x247   :  { %v545_v16 = vpop.f32.mrb[2].mxu1 }
 0x248   :  { %v1142_v17 = vpop.f32.mrb[3].mxu1 }
 0x267   :  { %v686_v18 = vpop.f32.mrb[4].mxu1 }
 0x268   :  { %v687_v19 = vadd.f32 %v686_v18, %v545_v16  ;;  %v1177_v20 = vpop.f32.mrb[5].mxu1 }
 0x287   :  { %v806_v33 = vpop.f32.mrb[2].mxu0  ;;  %v877_v34 = vpop.f32.mrb[6].mxu1 }
 0x288   :  { %v901_v36 = vadd.f32 %v889_v29, %v806_v33  ;;  %v883_v37 = vadd.f32 %v877_v34, %v687_v19  ;;  %v808_v1 = vpop.f32.mrb[3].mxu0  ;;  %v1212_v40 = vpop.f32.mrb[7].mxu1 }
 0x289   :  { %v902_v41 = vadd.f32 %v893_v30, %v808_v1 }
 0x28a   :  { %vm904_vm1 = vcmp.ge.f32.partialorder %v901_v36, 0.0  ;;  %v924_v42 = vmul.f32 %v912_v31, %v901_v36  ;;  %v903_v43 = vadd.f32 %v897_v32, %v883_v37 }
 0x28b   :  { %vm905_vm2 = vcmp.ge.f32.partialorder %v902_v41, 0.0  ;;  %v925_v45 = vmul.f32 %v916_v35, %v902_v41 }
 0x28c   :  { %v927_v46 = vsel %vm904_vm1, %v901_v36, %v924_v42  ;;  %vm906_vm3 = vcmp.ge.f32.partialorder %v903_v43, 0.0  ;;  %v926_v47 = vmul.f32 %v920_v39, %v903_v43 }
 0x28d   :  { %v930_v48 = vadd.f32 %v927_v46, %v1758_v38  ;;  %v928_v49 = vsel %vm905_vm2, %v902_v41, %v925_v45 }
 0x28e   :  { %v929_v50 = vsel %vm906_vm3, %v903_v43, %v926_v47  ;;  %v932_v51 = vadd.f32 %v928_v49, %v1734_v27 }
 0x28f   :  { %931 = vst [vmem:[#allocation11] sm:$0xff] %v930_v48  ;;  %v934_v52 = vadd.f32 %v929_v50, %v1732_v26 }
 0x290   :  { %933 = vst [vmem:[#allocation11 + $0x8] sm:$0xff] %v932_v51 }
 0x291   :  { %935 = vst [vmem:[#allocation11 + $0x10] sm:$0xff] %v934_v52 }
 0x292   :  { %1573 = shalt.err (!%p1570_p2)
}
 0x293   :  { %s1574_s19 = scalar_lea.hbm %s1823_s7, 384 }
 0x294   :  { %p1575_p3 = scmp.ne.s32.totalorder %s1823_s7, %s1574_s19  ;;  %p1578_p4 = scmp.lt.u32.totalorder %s1574_s19, %s1823_s7 }
 0x296   :  { %p1580_p5 = pnand %p1578_p4, %p1575_p3 }
 0x298   :  { %1583 = shalt.err (!%p1580_p5)
}
 0x299   :  { %945 = dma.vmem_to_hbm [thread:$0]  %s943_s6, 384, %s1823_s7, [#allocation4]  }
 0x29a   :  { %1590 = dma.done.wait [#allocation4], 384  }
 0x29b   :  { %1591 = vsyncadd [#allocation4], 4294966912 }
 0x29c   :  { %949 = vsyncpa [#allocation3], 1 }
 0x29d   :  { %950 = vsyncpa [#allocation6], 1 }
 0x29e   :  { %951 = vsyncpa [#allocation9], 1 }
 0x29f   :  { %952 = vsyncpa [#allocation4], 1 }

</bundles_post_ra>
